<compile_context>
chip_gen: v6e
topology: v6e:2x2x1
jax: 0.10.0
libtpu: 0.0.40
codegen_flags: <defaults>
</compile_context>

<pallas_src>
import math
import numpy as np
import jax
import jax.numpy as jnp
from jax.experimental import pallas as pl
from jax.experimental.pallas import tpu as pltpu

LOG_2PI = math.log(2.0 * math.pi)


# ---------------------------------------------------------------------------
# Host-side scalar constants (the __init__-time z_tilt normalizer).
# M(a,b,x) = Kummer confluent hypergeometric 1F1, G = gamma.  Scalar, computed
# once on host -> baked into the kernel as a constant.
# ---------------------------------------------------------------------------
def _hyp1f1(a, b, x, n_terms=500):
    term = 1.0
    s = 1.0
    for k in range(n_terms):
        term *= (a + k) * x / ((b + k) * (k + 1.0))
        s += term
        if abs(term) < 1e-16 * abs(s):
            break
    return s


def _z_tilt(nz, tilt):
    return (_hyp1f1(nz / 2.0, 0.5, tilt ** 2 / 2.0)
            + tilt * math.sqrt(2.0)
            * math.gamma((nz + 1) / 2.0) / math.gamma(nz / 2.0)
            * _hyp1f1((nz + 1) / 2.0, 1.5, tilt ** 2 / 2.0))


# ---------------------------------------------------------------------------
# Shared latent-term computation (runs on already-loaded f32 VMEM values,
# once per batch tile at the final reduction step).
# ---------------------------------------------------------------------------
def _latent_terms(z, mu, lv, nz, tilt, log_z_tilt):
    z_sq = jnp.sum(z * z, axis=-1, keepdims=True)                # (TB, 1)
    log_p_z = -0.5 * z_sq - 0.5 * nz * LOG_2PI
    if tilt is not None:
        log_p_z = log_p_z + tilt * jnp.sqrt(z_sq) - log_z_tilt
    z_eps = (z - mu) * jnp.exp(-0.5 * lv)
    const_q = 0.5 * nz * (LOG_2PI + math.log(nz))
    log_q_z_x = -(jnp.sum(0.5 * z_eps * z_eps + 0.5 * lv,
                          axis=-1, keepdims=True) + const_q)     # (TB, 1)
    return log_p_z, log_q_z_x


# ---------------------------------------------------------------------------
# L2 kernel: grid = (batch tiles, feature tiles), feature (reduction) axis last
# ---------------------------------------------------------------------------
def _make_l2_kernel(*, D, TD, nz, tilt, log_z_tilt):
    need_mask = (D % TD) != 0
    chunked = (TD % 128) == 0          # lane-resident accumulator path
    nk_s = -(-D // TD)
    tail = D - (nk_s - 1) * TD         # valid columns in the last step (static)

    def kernel(x_ref, xo_ref, z_ref, mu_ref, lv_ref, out_ref, acc_ref):
        k = pl.program_id(1)
        nk = pl.num_programs(1)

        @pl.when(k == 0)
        def _init():
            acc_ref[...] = jnp.zeros_like(acc_ref)

        def partial_sum(masked):
            if chunked:
                # Pure-VALU accumulation over 128-lane chunks (static ref
                # slices -> no relayout, no per-step cross-lane XLU reduce).
                limit = tail if masked else TD
                nfull, rem = limit // 128, limit % 128
                psum = None
                for c in range(nfull + (1 if rem else 0)):
                    lo = c * 128
                    d = (x_ref[:, lo:lo + 128].astype(jnp.float32)
                         - xo_ref[:, lo:lo + 128].astype(jnp.float32))
                    sq = d * d
                    if rem and c == nfull:            # partial tail chunk only
                        lane = jax.lax.broadcasted_iota(jnp.int32, (1, 128), 1)
                        sq = jnp.where(lane < rem, sq, 0.0)
                    psum = sq if psum is None else psum + sq
                return psum                            # (TB, 128)
            # Fallback (TD not a multiple of 128): v1-style full-tile reduce.
            d = x_ref[...].astype(jnp.float32) - xo_ref[...].astype(jnp.float32)
            sq = d * d
            if masked:
                col = jax.lax.broadcasted_iota(jnp.int32, sq.shape, 1)
                sq = jnp.where(col < tail, sq, 0.0)
            return jnp.sum(sq, axis=-1, keepdims=True)  # (TB, 1)

        if need_mask:
            # Mask cost only on the last reduction step.
            @pl.when(k < nk - 1)
            def _acc_fast():
                acc_ref[...] += partial_sum(False)

            @pl.when(k == nk - 1)
            def _acc_tail():
                acc_ref[...] += partial_sum(True)
        else:
            acc_ref[...] += partial_sum(False)

        @pl.when(k == nk - 1)
        def _finalize():
            # Single cross-lane reduce of the lane-resident accumulator.
            row_sq = jnp.sum(acc_ref[...], axis=-1, keepdims=True)   # (TB, 1)
            log_p_x_z = -jnp.sqrt(row_sq)
            log_p_z, log_q_z_x = _latent_terms(
                z_ref[...].astype(jnp.float32),
                mu_ref[...].astype(jnp.float32),
                lv_ref[...].astype(jnp.float32),
                nz, tilt, log_z_tilt)
            out_ref[...] = log_p_x_z + log_p_z - log_q_z_x

    return kernel


# ---------------------------------------------------------------------------
# Cross-entropy kernel: grid = (batch tiles, pixel tiles), pixel axis last.
# use_mxu=True offloads the two 256-wide class reductions to the MXU.
# ---------------------------------------------------------------------------
def _make_ce_kernel(*, P, TB, TP, nz, tilt, log_z_tilt, use_mxu):
    need_mask = (P % TP) != 0
    nk_s = -(-P // TP)
    tail = P - (nk_s - 1) * TP          # valid pixels in the last step (static)

    def kernel(x_ref, xo_ref, z_ref, mu_ref, lv_ref, out_ref, acc_ref):
        k = pl.program_id(1)
        nk = pl.num_programs(1)

        @pl.when(k == 0)
        def _init():
            acc_ref[...] = jnp.zeros_like(acc_ref)

        logits = xo_ref[...].astype(jnp.float32)                 # (TB, TP, 256)
        # Target class: raw cast like torch .long(); clip is a deliberate
        # safety net for x outside [0, 1] (documented behavioural choice).
        tgt = (x_ref[...].astype(jnp.float32) * 255.0).astype(jnp.int32)
        tgt = jnp.clip(tgt, 0, 255)                              # (TB, TP)

        m = jnp.max(logits, axis=-1, keepdims=True)              # XLU (kept)
        shifted = logits - m
        exp_s = jnp.exp(shifted)                                 # EUP (dominant)
        cls = jax.lax.broadcasted_iota(jnp.int32, (1, 1, 256), 2)
        picked_mat = jnp.where(cls == tgt[..., None], shifted, 0.0)

        if use_mxu:
            # MXU offload of the two additive 256-wide class reductions:
            # (TB*TP, 256) @ ones(256, 128) in f32 (HIGHEST precision for
            # parity with the f32 reference); take column 0.  Densify back to
            # (TB, TP) before the log so the per-pixel EUP/VALU ops stay on
            # dense, lane-packed tiles.
            ones = jnp.ones((256, 128), jnp.float32)
            hi = jax.lax.Precision.HIGHEST
            se = jnp.dot(exp_s.reshape(TB * TP, 256), ones,
                         precision=hi,
                         preferred_element_type=jnp.float32)[:, 0:1]
            pk = jnp.dot(picked_mat.reshape(TB * TP, 256), ones,
                         precision=hi,
                         preferred_element_type=jnp.float32)[:, 0:1]
            sum_exp = se.reshape(TB, TP)
            picked = pk.reshape(TB, TP)
        else:
            # XLU fallback (identical math).
            sum_exp = jnp.sum(exp_s, axis=-1)
            picked = jnp.sum(picked_mat, axis=-1)

        ce = jnp.log(sum_exp) - picked                           # (TB, TP)

        def acc_update(masked):
            v = ce
            if masked:
                pix = jax.lax.broadcasted_iota(jnp.int32, (1, TP), 1)
                # Selection (not multiply) -> NaN/Inf from padded logits is
                # safely discarded.
                v = jnp.where(pix < tail, ce, 0.0)
            acc_ref[...] += jnp.sum(v, axis=-1, keepdims=True)

        if need_mask:
            @pl.when(k < nk - 1)
            def _acc_fast():
                acc_update(False)

            @pl.when(k == nk - 1)
            def _acc_tail():
                acc_update(True)
        else:
            acc_update(False)

        @pl.when(k == nk - 1)
        def _finalize():
            log_p_x_z = -acc_ref[...]                            # (TB, 1)
            log_p_z, log_q_z_x = _latent_terms(
                z_ref[...].astype(jnp.float32),
                mu_ref[...].astype(jnp.float32),
                lv_ref[...].astype(jnp.float32),
                nz, tilt, log_z_tilt)
            out_ref[...] = log_p_x_z + log_p_z - log_q_z_x

    return kernel


# ---------------------------------------------------------------------------
# Tile-size selection.
# ---------------------------------------------------------------------------
def _pick_batch_tile(B, cap):
    """Multiple-of-8 batch tile; for B>=16 guarantee >=2 tiles so the
    'parallel' batch axis can be split across v7x's two TensorCores."""
    if B >= 16:
        half = max(8, ((B // 2) // 8) * 8)
        return min(cap, half)
    return min(B, cap)


def _pick_l2_red_tile(D, TB, itemsize):
    """Biggest 128-multiple feature tile keeping the two double-buffered
    input blocks under ~16 MiB (fits every chip with vmem_limit=32 MiB)."""
    budget = 16 * 1024 * 1024
    cap = budget // (2 * 2 * max(TB, 8) * itemsize)
    cap = max(512, min(8192, (cap // 128) * 128))
    return D if D <= cap else cap


# ---------------------------------------------------------------------------
# Wrapper
# ---------------------------------------------------------------------------
def compute_weight(x, x_out, mu, log_var, z, *, loss_type, tilt, nz,
                   tb=None, td=None, tp=None):
    B = x.shape[0]
    tilt_f = None if tilt is None else float(tilt)
    log_z_tilt = None if tilt is None else math.log(_z_tilt(nz, tilt_f))

    def lat_spec(TB):
        # Depends only on the batch index -> block stays resident (no re-DMA)
        # across the reduction grid axis.
        return pl.BlockSpec((TB, nz), lambda i, k: (i, 0))

    cparams = pltpu.CompilerParams(
        dimension_semantics=("parallel", "arbitrary"),
        vmem_limit_bytes=32 * 1024 * 1024)

    if loss_type == 'l2':
        D = int(np.prod(x.shape[1:]))
        TB = tb if tb is not None else _pick_batch_tile(B, 128)
        itemsize = max(x.dtype.itemsize, x_out.dtype.itemsize)
        TD = td if td is not None else _pick_l2_red_tile(D, TB, itemsize)
        acc_lanes = 128 if (TD % 128) == 0 else 1
        x_f = x.reshape(B, D)            # native dtype, no wrapper cast
        xo_f = x_out.reshape(B, D)
        kernel = _make_l2_kernel(D=D, TD=TD, nz=nz, tilt=tilt_f,
                                 log_z_tilt=log_z_tilt)
        grid = (pl.cdiv(B, TB), pl.cdiv(D, TD))
        in_specs = [
            pl.BlockSpec((TB, TD), lambda i, k: (i, k)),
            pl.BlockSpec((TB, TD), lambda i, k: (i, k)),
            lat_spec(TB), lat_spec(TB), lat_spec(TB),
        ]
        out = pl.pallas_call(
            kernel,
            out_shape=jax.ShapeDtypeStruct((B, 1), jnp.float32),
            grid=grid,
            in_specs=in_specs,
            out_specs=pl.BlockSpec((TB, 1), lambda i, k: (i, 0)),
            scratch_shapes=[pltpu.VMEM((TB, acc_lanes), jnp.float32)],
            compiler_params=cparams,
        )(x_f, xo_f, z, mu, log_var)
        return out[:, 0]

    elif loss_type == 'cross_entropy':
        P = int(np.prod(x.shape[1:]))
        TB = tb if tb is not None else _pick_batch_tile(B, 8)
        # TP capped at 256 to bound the double-buffered logits block plus
        # full-tile temporaries under v5e's 16 MiB scoped-VMEM default.
        TP = tp if tp is not None else (P if P <= 256 else 256)
        x_f = x.reshape(B, P)            # native dtype, no wrapper cast
        xo_f = x_out.reshape(B, P, 256)
        grid = (pl.cdiv(B, TB), pl.cdiv(P, TP))
        in_specs = [
            pl.BlockSpec((TB, TP), lambda i, k: (i, k)),
            pl.BlockSpec((TB, TP, 256), lambda i, k: (i, k, 0)),
            lat_spec(TB), lat_spec(TB), lat_spec(TB),
        ]

        def build(use_mxu):
            kern = _make_ce_kernel(P=P, TB=TB, TP=TP, nz=nz, tilt=tilt_f,
                                   log_z_tilt=log_z_tilt, use_mxu=use_mxu)
            return pl.pallas_call(
                kern,
                out_shape=jax.ShapeDtypeStruct((B, 1), jnp.float32),
                grid=grid,
                in_specs=in_specs,
                out_specs=pl.BlockSpec((TB, 1), lambda i, k: (i, 0)),
                scratch_shapes=[pltpu.VMEM((TB, 1), jnp.float32)],
                compiler_params=cparams,
            )

        try:
            out = build(True)(x_f, xo_f, z, mu, log_var)
        except Exception:
            # Conservative fallback: identical math with XLU class reductions
            # (guarantees the kernel runs even if the narrow reshape used by
            # the MXU offload is rejected by this Mosaic toolchain).
            out = build(False)(x_f, xo_f, z, mu, log_var)
        return out[:, 0]

    raise ValueError(loss_type)


# ---------------------------------------------------------------------------
# Pure-JAX reference (mirrors the PyTorch forward, with the intended names)
# ---------------------------------------------------------------------------
def reference(x, x_out, mu, log_var, z, *, loss_type, tilt, nz):
    if loss_type == 'l2':
        log_p_x_z = -jnp.sqrt(jnp.sum((x - x_out) ** 2, axis=(1, 2, 3)))
    else:
        B = x.shape[0]
        tgt = (x.reshape(-1) * 255.0).astype(jnp.int32)
        logits = x_out.reshape(-1, 256)
        lse = jax.scipy.special.logsumexp(logits, axis=-1)
        picked = jnp.take_along_axis(logits, tgt[:, None], axis=-1)[:, 0]
        log_p_x_z = -jnp.sum((lse - picked).reshape(B, -1), axis=1)

    log_p_z = -jnp.sum(z ** 2 / 2, axis=1) - nz / 2 * math.log(2 * math.pi)
    if tilt is not None:
        log_p_z = (log_p_z + tilt * jnp.linalg.norm(z, axis=1)
                   - math.log(_z_tilt(nz, tilt)))
    z_eps = (z - mu) / jnp.exp(0.5 * log_var)
    log_q_z_x = -jnp.sum(z_eps ** 2 / 2 + math.log(2 * math.pi) / 2
                         + log_var / 2 + math.log(nz) / 2, axis=1)
    return log_p_x_z + log_p_z - log_q_z_x


# ---------------------------------------------------------------------------
if __name__ == "__main__":
    key = jax.random.PRNGKey(0)
    ks = jax.random.split(key, 16)
    B, C, H, W, nz = 2, 4, 16, 16, 32

    # shared latents
    z = jax.random.normal(ks[2], (B, nz), jnp.float32)
    mu = 0.1 * jax.random.normal(ks[3], (B, nz), jnp.float32)
    log_var = 0.1 * jax.random.normal(ks[4], (B, nz), jnp.float32)

    # ---- 'l2' branch (with/without tilt), single-step + tiled/masked paths --
    x = jax.random.uniform(ks[0], (B, C, H, W), jnp.float32)
    x_out = jax.random.uniform(ks[1], (B, C, H, W), jnp.float32)
    for tilt in (None, 2.0):
        for td in (None, 384):   # td=384 -> 3 reduction steps + tail mask
            got = compute_weight(x, x_out, mu, log_var, z,
                                 loss_type='l2', tilt=tilt, nz=nz, td=td)
            jax.block_until_ready(got)
            ref = reference(x, x_out, mu, log_var, z,
                            loss_type='l2', tilt=tilt, nz=nz)
            np.testing.assert_allclose(np.asarray(got), np.asarray(ref),
                                       rtol=1e-4, atol=1e-3)

    # ---- 'l2' with bf16 inputs (narrow-dtype HBM streaming, cast on tile) ---
    x_bf, xo_bf = x.astype(jnp.bfloat16), x_out.astype(jnp.bfloat16)
    got = compute_weight(x_bf, xo_bf, mu, log_var, z,
                         loss_type='l2', tilt=2.0, nz=nz)
    jax.block_until_ready(got)
    ref = reference(x_bf.astype(jnp.float32), xo_bf.astype(jnp.float32),
                    mu, log_var, z, loss_type='l2', tilt=2.0, nz=nz)
    np.testing.assert_allclose(np.asarray(got), np.asarray(ref),
                               rtol=1e-4, atol=1e-3)

    # ---- 'l2' larger batch: >=2 batch tiles (dual-TensorCore split path) ----
    B2 = 32
    x2 = jax.random.uniform(ks[5], (B2, C, H, W), jnp.float32)
    xo2 = jax.random.uniform(ks[6], (B2, C, H, W), jnp.float32)
    z2 = jax.random.normal(ks[7], (B2, nz), jnp.float32)
    mu2 = 0.1 * jax.random.normal(ks[8], (B2, nz), jnp.float32)
    lv2 = 0.1 * jax.random.normal(ks[9], (B2, nz), jnp.float32)
    got = compute_weight(x2, xo2, mu2, lv2, z2, loss_type='l2',
                         tilt=None, nz=nz)
    jax.block_until_ready(got)
    ref = reference(x2, xo2, mu2, lv2, z2, loss_type='l2', tilt=None, nz=nz)
    np.testing.assert_allclose(np.asarray(got), np.asarray(ref),
                               rtol=1e-4, atol=1e-3)

    # ---- 'cross_entropy' branch: single-step path (MXU class reductions) ----
    x_ce = jax.random.uniform(ks[10], (B, 1, H, W), jnp.float32)   # in [0,1)
    x_out_ce = jax.random.normal(ks[11], (B, H * W, 256), jnp.float32)
    got_ce = compute_weight(x_ce, x_out_ce, mu, log_var, z,
                            loss_type='cross_entropy', tilt=None, nz=nz)
    jax.block_until_ready(got_ce)
    ref_ce = reference(x_ce, x_out_ce, mu, log_var, z,
                       loss_type='cross_entropy', tilt=None, nz=nz)
    np.testing.assert_allclose(np.asarray(got_ce), np.asarray(ref_ce),
                               rtol=1e-4, atol=1e-2)

    # ---- 'cross_entropy' branch: multi-step + tail-masked path --------------
    H2, W2 = 12, 16                                   # P=192, tp=128 -> mask
    x_ce2 = jax.random.uniform(ks[12], (B, 1, H2, W2), jnp.float32)
    x_out_ce2 = jax.random.normal(ks[13], (B, H2 * W2, 256), jnp.float32)
    got_ce2 = compute_weight(x_ce2, x_out_ce2, mu, log_var, z,
                             loss_type='cross_entropy', tilt=2.0, nz=nz,
                             tp=128)
    jax.block_until_ready(got_ce2)
    ref_ce2 = reference(x_ce2, x_out_ce2, mu, log_var, z,
                        loss_type='cross_entropy', tilt=2.0, nz=nz)
    np.testing.assert_allclose(np.asarray(got_ce2), np.asarray(ref_ce2),
                               rtol=1e-4, atol=1e-2)

    print("KERNEL_OK")
</pallas_src>

<mosaic_0001>
module attributes {stable_mosaic.version = 11 : i64} {
  func.func @kernel(%arg0: i32, %arg1: i32, %arg2: memref<2x1024xf32, #tpu.memory_space<vmem>>, %arg3: memref<2x1024xf32, #tpu.memory_space<vmem>>, %arg4: memref<2x32xf32, #tpu.memory_space<vmem>>, %arg5: memref<2x32xf32, #tpu.memory_space<vmem>>, %arg6: memref<2x32xf32, #tpu.memory_space<vmem>>, %arg7: memref<2x1xf32, #tpu.memory_space<vmem>>, %arg8: memref<2x128xf32, #tpu.memory_space<vmem>>) attributes {dimension_semantics = [#tpu.dimension_semantics<parallel>, #tpu.dimension_semantics<arbitrary>], iteration_bounds = array<i64: 1, 1>, scalar_prefetch = 0 : i64, scratch_operands = 1 : i64, tpu.core_type = #tpu.core_type<tc>, window_params = [{transform_indices = @transform_0, window_bounds = array<i64: 2, 1024>}, {transform_indices = @transform_1, window_bounds = array<i64: 2, 1024>}, {transform_indices = @transform_2, window_bounds = array<i64: 2, 32>}, {transform_indices = @transform_3, window_bounds = array<i64: 2, 32>}, {transform_indices = @transform_4, window_bounds = array<i64: 2, 32>}, {transform_indices = @transform_5, window_bounds = array<i64: 2, 1>}]} {
    %c0_i32 = arith.constant 0 : i32
    %0 = arith.cmpi eq, %arg1, %c0_i32 : i32
    %1 = arith.extui %0 : i1 to i32
    %c0_i32_0 = arith.constant 0 : i32
    %2 = arith.cmpi ne, %1, %c0_i32_0 : i32
    scf.if %2 {
      %cst = arith.constant 0.000000e+00 : f32
      %48 = vector.broadcast %cst : f32 to vector<2x128xf32>
      %c0_31 = arith.constant 0 : index
      %c0_32 = arith.constant 0 : index
      %49 = vector.load %arg8[%c0_31, %c0_32] : memref<2x128xf32, #tpu.memory_space<vmem>>, vector<2x128xf32>
      tpu.vector_store %arg8[%c0_31, %c0_32], %48 {strides = array<i32>} : memref<2x128xf32, #tpu.memory_space<vmem>>, vector<2x128xf32>,
    } else {
    }
    %c0 = arith.constant 0 : index
    %c0_1 = arith.constant 0 : index
    %3 = vector.load %arg8[%c0, %c0_1] : memref<2x128xf32, #tpu.memory_space<vmem>>, vector<2x128xf32>
    %c0_2 = arith.constant 0 : index
    %c0_3 = arith.constant 0 : index
    %4 = vector.load %arg2[%c0_2, %c0_3] : memref<2x1024xf32, #tpu.memory_space<vmem>>, vector<2x128xf32>
    %c0_4 = arith.constant 0 : index
    %c0_5 = arith.constant 0 : index
    %5 = vector.load %arg3[%c0_4, %c0_5] : memref<2x1024xf32, #tpu.memory_space<vmem>>, vector<2x128xf32>
    %6 = arith.subf %4, %5 : vector<2x128xf32>
    %7 = arith.mulf %6, %6 : vector<2x128xf32>
    %c0_6 = arith.constant 0 : index
    %c128 = arith.constant 128 : index
    %8 = vector.load %arg2[%c0_6, %c128] : memref<2x1024xf32, #tpu.memory_space<vmem>>, vector<2x128xf32>
    %c0_7 = arith.constant 0 : index
    %c128_8 = arith.constant 128 : index
    %9 = vector.load %arg3[%c0_7, %c128_8] : memref<2x1024xf32, #tpu.memory_space<vmem>>, vector<2x128xf32>
    %10 = arith.subf %8, %9 : vector<2x128xf32>
    %11 = arith.mulf %10, %10 : vector<2x128xf32>
    %12 = arith.addf %7, %11 : vector<2x128xf32>
    %c0_9 = arith.constant 0 : index
    %c256 = arith.constant 256 : index
    %13 = vector.load %arg2[%c0_9, %c256] : memref<2x1024xf32, #tpu.memory_space<vmem>>, vector<2x128xf32>
    %c0_10 = arith.constant 0 : index
    %c256_11 = arith.constant 256 : index
    %14 = vector.load %arg3[%c0_10, %c256_11] : memref<2x1024xf32, #tpu.memory_space<vmem>>, vector<2x128xf32>
    %15 = arith.subf %13, %14 : vector<2x128xf32>
    %16 = arith.mulf %15, %15 : vector<2x128xf32>
    %17 = arith.addf %12, %16 : vector<2x128xf32>
    %c0_12 = arith.constant 0 : index
    %c384 = arith.constant 384 : index
    %18 = vector.load %arg2[%c0_12, %c384] : memref<2x1024xf32, #tpu.memory_space<vmem>>, vector<2x128xf32>
    %c0_13 = arith.constant 0 : index
    %c384_14 = arith.constant 384 : index
    %19 = vector.load %arg3[%c0_13, %c384_14] : memref<2x1024xf32, #tpu.memory_space<vmem>>, vector<2x128xf32>
    %20 = arith.subf %18, %19 : vector<2x128xf32>
    %21 = arith.mulf %20, %20 : vector<2x128xf32>
    %22 = arith.addf %17, %21 : vector<2x128xf32>
    %c0_15 = arith.constant 0 : index
    %c512 = arith.constant 512 : index
    %23 = vector.load %arg2[%c0_15, %c512] : memref<2x1024xf32, #tpu.memory_space<vmem>>, vector<2x128xf32>
    %c0_16 = arith.constant 0 : index
    %c512_17 = arith.constant 512 : index
    %24 = vector.load %arg3[%c0_16, %c512_17] : memref<2x1024xf32, #tpu.memory_space<vmem>>, vector<2x128xf32>
    %25 = arith.subf %23, %24 : vector<2x128xf32>
    %26 = arith.mulf %25, %25 : vector<2x128xf32>
    %27 = arith.addf %22, %26 : vector<2x128xf32>
    %c0_18 = arith.constant 0 : index
    %c640 = arith.constant 640 : index
    %28 = vector.load %arg2[%c0_18, %c640] : memref<2x1024xf32, #tpu.memory_space<vmem>>, vector<2x128xf32>
    %c0_19 = arith.constant 0 : index
    %c640_20 = arith.constant 640 : index
    %29 = vector.load %arg3[%c0_19, %c640_20] : memref<2x1024xf32, #tpu.memory_space<vmem>>, vector<2x128xf32>
    %30 = arith.subf %28, %29 : vector<2x128xf32>
    %31 = arith.mulf %30, %30 : vector<2x128xf32>
    %32 = arith.addf %27, %31 : vector<2x128xf32>
    %c0_21 = arith.constant 0 : index
    %c768 = arith.constant 768 : index
    %33 = vector.load %arg2[%c0_21, %c768] : memref<2x1024xf32, #tpu.memory_space<vmem>>, vector<2x128xf32>
    %c0_22 = arith.constant 0 : index
    %c768_23 = arith.constant 768 : index
    %34 = vector.load %arg3[%c0_22, %c768_23] : memref<2x1024xf32, #tpu.memory_space<vmem>>, vector<2x128xf32>
    %35 = arith.subf %33, %34 : vector<2x128xf32>
    %36 = arith.mulf %35, %35 : vector<2x128xf32>
    %37 = arith.addf %32, %36 : vector<2x128xf32>
    %c0_24 = arith.constant 0 : index
    %c896 = arith.constant 896 : index
    %38 = vector.load %arg2[%c0_24, %c896] : memref<2x1024xf32, #tpu.memory_space<vmem>>, vector<2x128xf32>
    %c0_25 = arith.constant 0 : index
    %c896_26 = arith.constant 896 : index
    %39 = vector.load %arg3[%c0_25, %c896_26] : memref<2x1024xf32, #tpu.memory_space<vmem>>, vector<2x128xf32>
    %40 = arith.subf %38, %39 : vector<2x128xf32>
    %41 = arith.mulf %40, %40 : vector<2x128xf32>
    %42 = arith.addf %37, %41 : vector<2x128xf32>
    %43 = arith.addf %3, %42 : vector<2x128xf32>
    %c0_27 = arith.constant 0 : index
    %c0_28 = arith.constant 0 : index
    %44 = vector.load %arg8[%c0_27, %c0_28] : memref<2x128xf32, #tpu.memory_space<vmem>>, vector<2x128xf32>
    tpu.vector_store %arg8[%c0_27, %c0_28], %43 {strides = array<i32>} : memref<2x128xf32, #tpu.memory_space<vmem>>, vector<2x128xf32>,
    %c0_i32_29 = arith.constant 0 : i32
    %45 = arith.cmpi eq, %arg1, %c0_i32_29 : i32
    %46 = arith.extui %45 : i1 to i32
    %c0_i32_30 = arith.constant 0 : i32
    %47 = arith.cmpi ne, %46, %c0_i32_30 : i32
    scf.if %47 {
      %c0_31 = arith.constant 0 : index
      %c0_32 = arith.constant 0 : index
      %48 = vector.load %arg8[%c0_31, %c0_32] : memref<2x128xf32, #tpu.memory_space<vmem>>, vector<2x128xf32>
      %cst = arith.constant dense<0.000000e+00> : vector<2xf32>
      %49 = vector.multi_reduction <add>, %48, %cst [1] : vector<2x128xf32> to vector<2xf32>
      %50 = vector.shape_cast %49 : vector<2xf32> to vector<2x1xf32>
      %51 = math.sqrt %50 : vector<2x1xf32>
      %cst_33 = arith.constant 0.000000e+00 : f32
      %52 = vector.broadcast %cst_33 : f32 to vector<2x1xf32>
      %53 = arith.subf %52, %51 : vector<2x1xf32>
      %c0_34 = arith.constant 0 : index
      %c0_35 = arith.constant 0 : index
      %54 = vector.load %arg4[%c0_34, %c0_35] : memref<2x32xf32, #tpu.memory_space<vmem>>, vector<2x32xf32>
      %c0_36 = arith.constant 0 : index
      %c0_37 = arith.constant 0 : index
      %55 = vector.load %arg5[%c0_36, %c0_37] : memref<2x32xf32, #tpu.memory_space<vmem>>, vector<2x32xf32>
      %c0_38 = arith.constant 0 : index
      %c0_39 = arith.constant 0 : index
      %56 = vector.load %arg6[%c0_38, %c0_39] : memref<2x32xf32, #tpu.memory_space<vmem>>, vector<2x32xf32>
      %57 = arith.mulf %54, %54 : vector<2x32xf32>
      %cst_40 = arith.constant dense<0.000000e+00> : vector<2xf32>
      %58 = vector.multi_reduction <add>, %57, %cst_40 [1] : vector<2x32xf32> to vector<2xf32>
      %59 = vector.shape_cast %58 : vector<2xf32> to vector<2x1xf32>
      %cst_41 = arith.constant -5.000000e-01 : f32
      %60 = vector.broadcast %cst_41 : f32 to vector<2x1xf32>
      %61 = arith.mulf %60, %59 : vector<2x1xf32>
      %cst_42 = arith.constant 29.4060326 : f32
      %62 = vector.broadcast %cst_42 : f32 to vector<2x1xf32>
      %63 = arith.subf %61, %62 : vector<2x1xf32>
      %64 = arith.subf %54, %55 : vector<2x32xf32>
      %cst_43 = arith.constant -5.000000e-01 : f32
      %65 = vector.broadcast %cst_43 : f32 to vector<2x32xf32>
      %66 = arith.mulf %65, %56 : vector<2x32xf32>
      %67 = math.exp %66 : vector<2x32xf32>
      %68 = arith.mulf %64, %67 : vector<2x32xf32>
      %cst_44 = arith.constant 5.000000e-01 : f32
      %69 = vector.broadcast %cst_44 : f32 to vector<2x32xf32>
      %70 = arith.mulf %69, %68 : vector<2x32xf32>
      %71 = arith.mulf %70, %68 : vector<2x32xf32>
      %cst_45 = arith.constant 5.000000e-01 : f32
      %72 = vector.broadcast %cst_45 : f32 to vector<2x32xf32>
      %73 = arith.mulf %72, %56 : vector<2x32xf32>
      %74 = arith.addf %71, %73 : vector<2x32xf32>
      %cst_46 = arith.constant dense<0.000000e+00> : vector<2xf32>
      %75 = vector.multi_reduction <add>, %74, %cst_46 [1] : vector<2x32xf32> to vector<2xf32>
      %76 = vector.shape_cast %75 : vector<2xf32> to vector<2x1xf32>
      %cst_47 = arith.constant 84.857811 : f32
      %77 = vector.broadcast %cst_47 : f32 to vector<2x1xf32>
      %78 = arith.addf %76, %77 : vector<2x1xf32>
      %cst_48 = arith.constant 0.000000e+00 : f32
      %79 = vector.broadcast %cst_48 : f32 to vector<2x1xf32>
      %80 = arith.subf %79, %78 : vector<2x1xf32>
      %81 = arith.addf %53, %63 : vector<2x1xf32>
      %82 = arith.subf %81, %80 : vector<2x1xf32>
      %c0_49 = arith.constant 0 : index
      %c0_50 = arith.constant 0 : index
      %83 = vector.load %arg7[%c0_49, %c0_50] : memref<2x1xf32, #tpu.memory_space<vmem>>, vector<2x1xf32>
      tpu.vector_store %arg7[%c0_49, %c0_50], %82 {strides = array<i32>} : memref<2x1xf32, #tpu.memory_space<vmem>>, vector<2x1xf32>,
    } else {
    }
    return
  }
  func.func @transform_0(%arg0: i32, %arg1: i32) -> (i32, i32) {
    %c0_i32 = arith.constant 0 : i32
    return %arg0, %arg1 : i32, i32
  }
  func.func @transform_1(%arg0: i32, %arg1: i32) -> (i32, i32) {
    %c0_i32 = arith.constant 0 : i32
    return %arg0, %arg1 : i32, i32
  }
  func.func @transform_2(%arg0: i32, %arg1: i32) -> (i32, i32) {
    %c0_i32 = arith.constant 0 : i32
    %c0_i32_0 = arith.constant 0 : i32
    return %arg0, %c0_i32 : i32, i32
  }
  func.func @transform_3(%arg0: i32, %arg1: i32) -> (i32, i32) {
    %c0_i32 = arith.constant 0 : i32
    %c0_i32_0 = arith.constant 0 : i32
    return %arg0, %c0_i32 : i32, i32
  }
  func.func @transform_4(%arg0: i32, %arg1: i32) -> (i32, i32) {
    %c0_i32 = arith.constant 0 : i32
    %c0_i32_0 = arith.constant 0 : i32
    return %arg0, %c0_i32 : i32, i32
  }
  func.func @transform_5(%arg0: i32, %arg1: i32) -> (i32, i32) {
    %c0_i32 = arith.constant 0 : i32
    %c0_i32_0 = arith.constant 0 : i32
    return %arg0, %c0_i32 : i32, i32
  }
}

</mosaic_0001>

<bundles_post_ra>
// kernel: tpu_custom_call.1
= control target key start
LH: loop header
LB: loop body
LE: loop exit
PB: predicated region body
PF: predicated region fallthrough
CT: control target
= control target key end

     0   :  { %10 = vsyncpa [#allocation4], 0  ;;  %s244_s0 = inlined_call_operand.hbm [shape: f32[2,1024], index: 0, kind: input, shape index: {}]   ;;  %s245_s1 = inlined_call_operand.hbm [shape: f32[2,1024], index: 1, kind: input, shape index: {}]   ;;  %s246_s2 = inlined_call_operand.vmem [shape: f32[2,32], index: 2, kind: input, shape index: {}]   ;;  %s247_s3 = inlined_call_operand.vmem [shape: f32[2,32], index: 3, kind: input, shape index: {}]   ;;  %s248_s4 = inlined_call_operand.vmem [shape: f32[2,32], index: 4, kind: input, shape index: {}]   ;;  %s249_s5 = inlined_call_operand.vmem [shape: f32[2,1], index: 5, kind: output, shape index: {}]  }
   0x1   :  { %11 = vsyncpa [#allocation6], 0  ;;  %s193_s18 = smov [#allocation3]   ;;  %s194_s20 = smov [#allocation5]  }
   0x2   :  { %s18_s19 = sshll.u32 %s193_s18, 4  ;;  %s28_s21 = sshll.u32 %s194_s20, 4  ;;  %s19_s19 = int_to_ptr.vmem [resolvable:$true] %s18_s19  ;;  %s29_s21 = int_to_ptr.vmem [resolvable:$true] %s28_s21 }
   0x3   :  { %s157_s22 = scalar_lea.vmem %s19_s19, 256  ;;  %p162_p1 = scmp.lt.s32.totalorder %s19_s19, %s19_s19 }
   0x4   :  { %p158_p0 = scmp.ne.s32.totalorder %s19_s19, %s157_s22  ;;  %p163_p2 = scmp.lt.s32.totalorder %s157_s22, %s157_s22 }
   0x6   :  { %p164_p3 = por %p163_p2, %p162_p1 }
   0x8   :  { %p165_p4 = pnand %p164_p3, %p158_p0 }
   0xa   :  { %168 = shalt.err (!%p165_p4)
}
   0xb   :  { %21 = dma.hbm_to_vmem [thread:$0]  %s244_s0, 256, %s19_s19, [#allocation4]  }
   0xc   :  { %s177_s25 = scalar_lea.vmem %s29_s21, 256  ;;  %p182_p6 = scmp.lt.s32.totalorder %s29_s21, %s29_s21 }
   0xd   :  { %p178_p5 = scmp.ne.s32.totalorder %s29_s21, %s177_s25  ;;  %p183_p7 = scmp.lt.s32.totalorder %s177_s25, %s177_s25 }
   0xf   :  { %p184_p8 = por %p183_p7, %p182_p6 }
  0x11   :  { %p185_p9 = pnand %p184_p8, %p178_p5 }
  0x13   :  { %188 = shalt.err (!%p185_p9)
}
  0x14   :  { %31 = dma.hbm_to_vmem [thread:$0]  %s245_s1, 256, %s29_s21, [#allocation6]  }
  0x15   :  { %189 = dma.done.wait [#allocation4], 256  }
  0x16   :  { %190 = vsyncadd [#allocation4], 4294967040 }
  0x17   :  { %191 = dma.done.wait [#allocation6], 256  }
  0x18   :  { %192 = vsyncadd [#allocation6], 4294967040  ;;  %v195_v0 = vmov 0.0   ;;  %v50_v1 = vld [vmem:[#allocation3] sm:$0x3]  ;;  %vm95_vm0 = vcmask 1041408  }
  0x19   :  { %48 = vst [vmem:[#allocation2] sm:$0x3] %v195_v0  ;;  %v51_v2 = vld [vmem:[#allocation5] sm:$0x3]  ;;  %v54_v3 = vld [vmem:[#allocation3 + $0x2] sm:$0x3] }
  0x1a   :  { %v52_v4 = vsub.f32 %v50_v1, %v51_v2  ;;  %v55_v5 = vld [vmem:[#allocation5 + $0x2] sm:$0x3]  ;;  %v59_v6 = vld [vmem:[#allocation3 + $0x4] sm:$0x3]  ;;  %v60_v8 = vld [vmem:[#allocation5 + $0x4] sm:$0x3] }
  0x1b   :  { %v56_v7 = vsub.f32 %v54_v3, %v55_v5  ;;  %v64_v9 = vld [vmem:[#allocation3 + $0x6] sm:$0x3]  ;;  %v65_v10 = vld [vmem:[#allocation5 + $0x6] sm:$0x3]  ;;  %v61_v12 = vsub.f32 %v59_v6, %v60_v8  ;;  %v69_v14 = vld [vmem:[#allocation3 + $0x8] sm:$0x3] }
  0x1c   :  { %v53_v11 = vmul.f32 %v52_v4, %v52_v4  ;;  %v66_v13 = vsub.f32 %v64_v9, %v65_v10  ;;  %v70_v15 = vld [vmem:[#allocation5 + $0x8] sm:$0x3]  ;;  %v74_v16 = vld [vmem:[#allocation3 + $0xa] sm:$0x3]  ;;  %v75_v19 = vld [vmem:[#allocation5 + $0xa] sm:$0x3] }
  0x1d   :  { %v57_v17 = vmul.f32 %v56_v7, %v56_v7  ;;  %v71_v18 = vsub.f32 %v69_v14, %v70_v15  ;;  %v62_v20 = vmul.f32 %v61_v12, %v61_v12  ;;  %v79_v21 = vld [vmem:[#allocation3 + $0xc] sm:$0x3]  ;;  %v80_v22 = vld [vmem:[#allocation5 + $0xc] sm:$0x3]  ;;  %v76_v25 = vsub.f32 %v74_v16, %v75_v19  ;;  %v109_v26 = vld [vmem:[%s248_s4] sm:$0x3] }
  0x1e   :  { %v67_v24 = vmul.f32 %v66_v13, %v66_v13  ;;  %v84_v27 = vld [vmem:[#allocation3 + $0xe] sm:$0x3]  ;;  %v85_v28 = vld [vmem:[#allocation5 + $0xe] sm:$0x3]  ;;  %v118_v29 = vmul.f32 -0.5, %v109_v26  ;;  %v81_v32 = vsub.f32 %v79_v21, %v80_v22  ;;  %v124_v51 = vmul.f32 0.5, %v109_v26 }
  0x1f   :  { %v58_v23 = vadd.f32 %v57_v17, %v53_v11  ;;  %v72_v31 = vmul.f32 %v71_v18, %v71_v18  ;;  %v77_v35 = vmul.f32 %v76_v25, %v76_v25  ;;  %v86_v36 = vsub.f32 %v84_v27, %v85_v28  ;;  %v107_v44 = vld [vmem:[%s246_s2] sm:$0x3] }
  0x20   :  { %v119_v33 = vmul.f32 1.442695, %v118_v29  ;;  %v82_v38 = vmul.f32 %v81_v32, %v81_v32  ;;  %v49_v42 = vld [vmem:[#allocation2] sm:$0x3]  ;;  %v110_v52 = vmul.f32 %v107_v44, %v107_v44  ;;  %vm111_vm1 = vcmask 254976  }
  0x21   :  { %v63_v30 = vadd.f32 %v62_v20, %v58_v23  ;;  %v87_v40 = vmul.f32 %v86_v36, %v86_v36  ;;  %v108_v45 = vld [vmem:[%s247_s3] sm:$0x3]  ;;  %vm133_vm4 = vcmask 1024  }
  0x22   :  { %145 = vpow2.f32 %v119_v33  ;;  %v117_v47 = vsub.f32 %v107_v44, %v108_v45  ;;  %v112_v57 = vsel %vm111_vm1, %v110_v52, 0.0 }
  0x23   :  { %v68_v34 = vadd.f32 %v67_v24, %v63_v30 }
  0x25   :  { %v73_v37 = vadd.f32 %v72_v31, %v68_v34 }
  0x27   :  { %v78_v39 = vadd.f32 %v77_v35, %v73_v37 }
  0x29   :  { %v83_v41 = vadd.f32 %v82_v38, %v78_v39 }
  0x2b   :  { %v88_v43 = vadd.f32 %v87_v40, %v83_v41 }
  0x2d   :  { %v89_v46 = vadd.f32 %v88_v43, %v49_v42 }
  0x2f   :  { %90 = vst [vmem:[#allocation2] sm:$0x3] %v89_v46  ;;  %v146_v48 = vpop.eup %145 }
  0x30   :  { %v121_v49 = vmul.f32 %v146_v48, %v117_v47 }
  0x32   :  { %v122_v50 = vmul.f32 0.5, %v121_v49 }
  0x34   :  { %v123_v54 = vmul.f32 %v122_v50, %v121_v49 }
  0x36   :  { %v94_v53 = vld [vmem:[#allocation2] sm:$0x3]  ;;  %v125_v56 = vadd.f32 %v124_v51, %v123_v54 }
  0x37   :  { %v96_v55 = vsel %vm95_vm0, %v94_v53, 0.0 }
  0x38   :  { %97 = vadd.xlane.f32.xlu0 %v96_v55  ;;  %v126_v58 = vsel %vm111_vm1, %v125_v56, 0.0 }
  0x39   :  { %127 = vadd.xlane.f32.xlu1 %v126_v58 }
  0x3c   :  { %113 = vadd.xlane.f32.xlu0 %v112_v57 }
  0xc1   :  { %v98_v59 = vpop.xlane.xlu0 %97 }
  0xc2   :  { %147 = vrsqrt.f32 %v98_v59  ;;  %v128_v61 = vpop.xlane.xlu1 %127  ;;  %vm101_vm2 = vcmp.eq.f32.partialorder %v98_v59, inf  ;;  %v104_v2 = vand.u32 2147483648, %v98_v59  ;;  %vm103_vm3 = vcmp.eq.f32.partialorder %v98_v59, 0.0 }
  0xc3   :  { %v129_v1 = vadd.f32 84.85781, %v128_v61 }
  0xc5   :  { %v114_v60 = vpop.xlane.xlu0 %113  ;;  %v130_v7 = vsub.f32 0.0, %v129_v1 }
  0xc6   :  { %v115_v62 = vmul.f32 -0.5, %v114_v60 }
  0xc8   :  { %v141_v4 = vadd.f32 -29.406033, %v115_v62 }
  0xcf   :  { %v148_v63 = vpop.eup %147 }
  0xd0   :  { %v100_v0 = vmul.f32 %v148_v63, %v98_v59 }
  0xd2   :  { %v102_v3 = vsel %vm101_vm2, %v98_v59, %v100_v0 }
  0xd3   :  { %v105_v5 = vsel %vm103_vm3, %v104_v2, %v102_v3 }
  0xd4   :  { %v106_v6 = vsub.f32 0.0, %v105_v5 }
  0xd6   :  { %v131_v8 = vadd.f32 %v141_v4, %v106_v6 }
  0xd8   :  { %v132_v9 = vsub.f32 %v131_v8, %v130_v7 }
  0xda   :  { %134 = vst.msk [vmem:[%s249_s5] sm:$0x3] %vm133_vm4, %v132_v9 }
  0xdb   :  { %139 = vsyncpa [#allocation4], 1 }
  0xdc   :  { %140 = vsyncpa [#allocation6], 1 }

</bundles_post_ra>
